<compile_context>
chip_gen: v7x
topology: tpu7x:2x2x1
jax: 0.10.0
libtpu: 0.0.40
codegen_flags: <defaults>
</compile_context>

<pallas_src>
import jax
import jax.numpy as jnp
from jax.experimental import pallas as pl
from jax.experimental.pallas import tpu as pltpu


def valuenet_kernel(xT_ref, w1_ref, b1_ref, w2_ref, b2_ref, o_ref):
    # xT_ref: (S, TB)  batch on lanes
    # w1_ref: (H, S)   torch fc1.weight layout
    # b1_ref: (H, 1)
    # w2_ref: (H, 1)   fc2 weight as a column
    # b2_ref: (1, 1)   scalar in SMEM
    # o_ref : (1, TB)  lane-dense output row
    S = xT_ref.shape[0]
    H = w1_ref.shape[0]
    TB = xT_ref.shape[1]

    if S <= 8:
        # K is tiny: a handful of broadcast-FMAs on the VPU; skip the MXU.
        h = jnp.broadcast_to(b1_ref[...], (H, TB))
        for k in range(S):
            h = h + w1_ref[:, k:k + 1] * xT_ref[k:k + 1, :]
    else:
        h = jnp.dot(w1_ref[...], xT_ref[...],
                    preferred_element_type=jnp.float32) + b1_ref[...]

    h = jnp.maximum(h, 0.0)  # ReLU, (H, TB)

    # fc2: elementwise multiply (VPU) + sublane reduce (XLU); no N=1 matmul.
    o = jnp.sum(h * w2_ref[...], axis=0, keepdims=True) + b2_ref[0, 0]
    o_ref[...] = o.astype(o_ref.dtype)


def value_net_forward(x, w1, b1, w2, b2, *, batch_tile=256):
    """Forward pass of ValueNet.

    x : (B, state_dim) f32
    w1: (hidden_dim, state_dim)  -- torch fc1.weight layout
    b1: (hidden_dim,)            -- torch fc1.bias
    w2: (1, hidden_dim)          -- torch fc2.weight layout
    b2: (1,)                     -- torch fc2.bias
    returns (B, 1) f32
    """
    B, S = x.shape
    H, _ = w1.shape

    # Lane-dense batch tile: a multiple of 128, no larger than needed.
    tb = max(128, (min(batch_tile, pl.cdiv(B, 128) * 128) // 128) * 128)
    num_tiles = pl.cdiv(B, tb)
    b_pad = num_tiles * tb

    if b_pad != B:
        x = jnp.pad(x, ((0, b_pad - B), (0, 0)))
    xT = x.T  # (S, b_pad): batch along lanes (wrapper-side layout plumbing)

    b1c = b1.reshape(H, 1)
    w2c = w2.reshape(H, 1)
    b2c = b2.reshape(1, 1)

    cost = pl.CostEstimate(
        flops=2 * B * S * H + 2 * B * H,
        transcendentals=0,
        bytes_accessed=4 * (B * S + H * S + 2 * H + 1 + B),
    )

    out = pl.pallas_call(
        valuenet_kernel,
        out_shape=jax.ShapeDtypeStruct((1, b_pad), jnp.float32),
        grid=(num_tiles,),
        in_specs=[
            pl.BlockSpec((S, tb), lambda i: (0, i)),    # x tile, batch on lanes
            pl.BlockSpec((H, S), lambda i: (0, 0)),     # w1, resident across grid
            pl.BlockSpec((H, 1), lambda i: (0, 0)),     # b1, resident
            pl.BlockSpec((H, 1), lambda i: (0, 0)),     # w2 column, resident
            pl.BlockSpec(memory_space=pltpu.MemorySpace.SMEM),  # b2 scalar
        ],
        out_specs=pl.BlockSpec((1, tb), lambda i: (0, i)),
        compiler_params=pltpu.CompilerParams(
            dimension_semantics=("parallel",),  # v7x: batch tiles over both TCs
        ),
        cost_estimate=cost,
    )(xT, w1, b1c, w2c, b2c)

    # Back to PyTorch's (B, 1) output layout, dropping batch padding.
    return out[0, :B].reshape(B, 1)


def init_params(key, state_dim, hidden_dim):
    """Deterministic init mirroring torch.nn.Linear default (U[-1/sqrt(fan_in), ...])."""
    k1, k2, k3, k4 = jax.random.split(key, 4)
    bound1 = 1.0 / jnp.sqrt(jnp.float32(state_dim))
    bound2 = 1.0 / jnp.sqrt(jnp.float32(hidden_dim))
    # Torch layouts: fc1.weight (H, S), fc1.bias (H,), fc2.weight (1, H), fc2.bias (1,)
    w1 = jax.random.uniform(k1, (hidden_dim, state_dim), jnp.float32, -bound1, bound1)
    b1 = jax.random.uniform(k2, (hidden_dim,), jnp.float32, -bound1, bound1)
    w2 = jax.random.uniform(k3, (1, hidden_dim), jnp.float32, -bound2, bound2)
    b2 = jax.random.uniform(k4, (1,), jnp.float32, -bound2, bound2)
    return w1, b1, w2, b2


if __name__ == "__main__":
    state_dim = 4       # CartPole-v0 observation dim
    hidden_dim = 128
    batch = 8

    key = jax.random.PRNGKey(0)
    kx, kp = jax.random.split(key)
    x = jax.random.normal(kx, (batch, state_dim), jnp.float32)
    w1, b1, w2, b2 = init_params(kp, state_dim, hidden_dim)

    out = value_net_forward(x, w1, b1, w2, b2)
    out = jax.block_until_ready(out)

    # Cross-check against pure-JAX reference (torch layout: x @ W^T + b).
    ref = jnp.maximum(x @ w1.T + b1, 0.0) @ w2.T + b2
    assert out.shape == (batch, 1)
    assert jnp.allclose(out, ref, atol=1e-4, rtol=1e-4)

    print("KERNEL_OK")
</pallas_src>

<mosaic_0001>
module attributes {stable_mosaic.version = 11 : i64} {
  func.func @valuenet_kernel(%arg0: i32, %arg1: memref<4x128xf32, #tpu.memory_space<vmem>>, %arg2: memref<128x4xf32, #tpu.memory_space<vmem>>, %arg3: memref<128x1xf32, #tpu.memory_space<vmem>>, %arg4: memref<128x1xf32, #tpu.memory_space<vmem>>, %arg5: memref<1x1xf32, #tpu.memory_space<smem>>, %arg6: memref<1x128xf32, #tpu.memory_space<vmem>>) attributes {dimension_semantics = [#tpu.dimension_semantics<parallel>], iteration_bounds = array<i64: 1>, scalar_prefetch = 0 : i64, scratch_operands = 0 : i64, tpu.core_type = #tpu.core_type<tc>, window_params = [{transform_indices = @transform_0, window_bounds = array<i64: 4, 128>}, {pipeline_mode = #tpu.pipeline_mode<synchronous>, transform_indices = @transform_1, window_bounds = array<i64: 128, 4>}, {pipeline_mode = #tpu.pipeline_mode<synchronous>, transform_indices = @transform_2, window_bounds = array<i64: 128, 1>}, {pipeline_mode = #tpu.pipeline_mode<synchronous>, transform_indices = @transform_3, window_bounds = array<i64: 128, 1>}, {transform_indices = @transform_4, window_bounds = array<i64: 1, 1>}, {transform_indices = @transform_5, window_bounds = array<i64: 1, 128>}]} {
    %c0 = arith.constant 0 : index
    %c0_0 = arith.constant 0 : index
    %0 = vector.load %arg3[%c0, %c0_0] : memref<128x1xf32, #tpu.memory_space<vmem>>, vector<128x1xf32>
    %1 = vector.shape_cast %0 : vector<128x1xf32> to vector<128x1xf32>
    %2 = vector.broadcast %1 : vector<128x1xf32> to vector<128x128xf32>
    %c0_1 = arith.constant 0 : index
    %c0_2 = arith.constant 0 : index
    %3 = vector.load %arg2[%c0_1, %c0_2] : memref<128x4xf32, #tpu.memory_space<vmem>>, vector<128x1xf32>
    %c0_3 = arith.constant 0 : index
    %c0_4 = arith.constant 0 : index
    %4 = vector.load %arg1[%c0_3, %c0_4] : memref<4x128xf32, #tpu.memory_space<vmem>>, vector<1x128xf32>
    %5 = vector.broadcast %3 : vector<128x1xf32> to vector<128x128xf32>
    %6 = vector.broadcast %4 : vector<1x128xf32> to vector<128x128xf32>
    %7 = arith.mulf %5, %6 : vector<128x128xf32>
    %8 = arith.addf %2, %7 : vector<128x128xf32>
    %c0_5 = arith.constant 0 : index
    %c1 = arith.constant 1 : index
    %9 = vector.load %arg2[%c0_5, %c1] : memref<128x4xf32, #tpu.memory_space<vmem>>, vector<128x1xf32>
    %c1_6 = arith.constant 1 : index
    %c0_7 = arith.constant 0 : index
    %10 = vector.load %arg1[%c1_6, %c0_7] : memref<4x128xf32, #tpu.memory_space<vmem>>, vector<1x128xf32>
    %11 = vector.broadcast %9 : vector<128x1xf32> to vector<128x128xf32>
    %12 = vector.broadcast %10 : vector<1x128xf32> to vector<128x128xf32>
    %13 = arith.mulf %11, %12 : vector<128x128xf32>
    %14 = arith.addf %8, %13 : vector<128x128xf32>
    %c0_8 = arith.constant 0 : index
    %c2 = arith.constant 2 : index
    %15 = vector.load %arg2[%c0_8, %c2] : memref<128x4xf32, #tpu.memory_space<vmem>>, vector<128x1xf32>
    %c2_9 = arith.constant 2 : index
    %c0_10 = arith.constant 0 : index
    %16 = vector.load %arg1[%c2_9, %c0_10] : memref<4x128xf32, #tpu.memory_space<vmem>>, vector<1x128xf32>
    %17 = vector.broadcast %15 : vector<128x1xf32> to vector<128x128xf32>
    %18 = vector.broadcast %16 : vector<1x128xf32> to vector<128x128xf32>
    %19 = arith.mulf %17, %18 : vector<128x128xf32>
    %20 = arith.addf %14, %19 : vector<128x128xf32>
    %c0_11 = arith.constant 0 : index
    %c3 = arith.constant 3 : index
    %21 = vector.load %arg2[%c0_11, %c3] : memref<128x4xf32, #tpu.memory_space<vmem>>, vector<128x1xf32>
    %c3_12 = arith.constant 3 : index
    %c0_13 = arith.constant 0 : index
    %22 = vector.load %arg1[%c3_12, %c0_13] : memref<4x128xf32, #tpu.memory_space<vmem>>, vector<1x128xf32>
    %23 = vector.broadcast %21 : vector<128x1xf32> to vector<128x128xf32>
    %24 = vector.broadcast %22 : vector<1x128xf32> to vector<128x128xf32>
    %25 = arith.mulf %23, %24 : vector<128x128xf32>
    %26 = arith.addf %20, %25 : vector<128x128xf32>
    %cst = arith.constant 0.000000e+00 : f32
    %27 = vector.broadcast %cst : f32 to vector<128x128xf32>
    %28 = arith.maximumf %26, %27 : vector<128x128xf32>
    %c0_14 = arith.constant 0 : index
    %c0_15 = arith.constant 0 : index
    %29 = vector.load %arg4[%c0_14, %c0_15] : memref<128x1xf32, #tpu.memory_space<vmem>>, vector<128x1xf32>
    %30 = vector.broadcast %29 : vector<128x1xf32> to vector<128x128xf32>
    %31 = arith.mulf %28, %30 : vector<128x128xf32>
    %cst_16 = arith.constant dense<0.000000e+00> : vector<128xf32>
    %32 = vector.multi_reduction <add>, %31, %cst_16 [0] : vector<128x128xf32> to vector<128xf32>
    %33 = vector.shape_cast %32 : vector<128xf32> to vector<1x128xf32>
    %c0_17 = arith.constant 0 : index
    %c0_18 = arith.constant 0 : index
    %34 = memref.load %arg5[%c0_17, %c0_18] : memref<1x1xf32, #tpu.memory_space<smem>>
    %35 = vector.broadcast %34 : f32 to vector<1x128xf32>
    %36 = arith.addf %33, %35 : vector<1x128xf32>
    %c0_19 = arith.constant 0 : index
    %c0_20 = arith.constant 0 : index
    %37 = vector.load %arg6[%c0_19, %c0_20] : memref<1x128xf32, #tpu.memory_space<vmem>>, vector<1x128xf32>
    tpu.vector_store %arg6[%c0_19, %c0_20], %36 {strides = array<i32>} : memref<1x128xf32, #tpu.memory_space<vmem>>, vector<1x128xf32>,
    return
  }
  func.func @transform_0(%arg0: i32) -> (i32, i32) {
    %c0_i32 = arith.constant 0 : i32
    %c0_i32_0 = arith.constant 0 : i32
    return %c0_i32, %arg0 : i32, i32
  }
  func.func @transform_1(%arg0: i32) -> (i32, i32) {
    %c0_i32 = arith.constant 0 : i32
    %c0_i32_0 = arith.constant 0 : i32
    %c0_i32_1 = arith.constant 0 : i32
    return %c0_i32, %c0_i32_0 : i32, i32
  }
  func.func @transform_2(%arg0: i32) -> (i32, i32) {
    %c0_i32 = arith.constant 0 : i32
    %c0_i32_0 = arith.constant 0 : i32
    %c0_i32_1 = arith.constant 0 : i32
    return %c0_i32, %c0_i32_0 : i32, i32
  }
  func.func @transform_3(%arg0: i32) -> (i32, i32) {
    %c0_i32 = arith.constant 0 : i32
    %c0_i32_0 = arith.constant 0 : i32
    %c0_i32_1 = arith.constant 0 : i32
    return %c0_i32, %c0_i32_0 : i32, i32
  }
  func.func @transform_4(%arg0: i32) -> (i32, i32) {
    %c0_i32 = arith.constant 0 : i32
    %c0_i32_0 = arith.constant 0 : i32
    %c0_i32_1 = arith.constant 0 : i32
    return %c0_i32, %c0_i32_0 : i32, i32
  }
  func.func @transform_5(%arg0: i32) -> (i32, i32) {
    %c0_i32 = arith.constant 0 : i32
    %c0_i32_0 = arith.constant 0 : i32
    return %c0_i32, %arg0 : i32, i32
  }
}

</mosaic_0001>

<bundles_post_ra>
// kernel: tpu_custom_call.1
= control target key start
LH: loop header
LB: loop body
LE: loop exit
PB: predicated region body
PF: predicated region fallthrough
CT: control target
= control target key end

     0   :  { %v765_v2 = vmov 1   ;;  %v766_v3 = vmov 0   ;;  %s1266_s0 = inlined_call_operand.vmem [shape: f32[4,128], index: 0, kind: input, shape index: {}]   ;;  %s1267_s1 = inlined_call_operand.vmem [shape: f32[128,4], index: 1, kind: input, shape index: {}]   ;;  %s1268_s2 = inlined_call_operand.vmem [shape: f32[128,1], index: 2, kind: input, shape index: {}]   ;;  %s1269_s3 = inlined_call_operand.vmem [shape: f32[128,1], index: 3, kind: input, shape index: {}]   ;;  %s1270_s4 = inlined_call_operand.<no memory space> [shape: f32[1,1], index: 4, kind: input, shape index: {}]   ;;  %s1271_s5 = inlined_call_operand.hbm [shape: f32[1,128], index: 5, kind: output, shape index: {}]  }
   0x1   :  { %v803_v0 = vld [vmem:[%s1267_s1] sm:$0xff]  ;;  %v24_v1 = vld [vmem:[%s1268_s2 + $0x10] sm:$0xff]  ;;  %731 = vset.pattern.permute.xlu0 %v765_v2  ;;  %730 = vset.pattern.permute.xlu1 %v766_v3  ;;  %v813_v4 = vld [vmem:[%s1267_s1 + $0x18] sm:$0xff] }
   0x2   :  { %253 = vperm.xlu0 %731, %v803_v0   ;;  %50 = vperm.xlu1 %730, %v24_v1   ;;  %v25_v5 = vld [vmem:[%s1268_s2 + $0x18] sm:$0xff]  ;;  %v822_v6 = vld [vmem:[%s1267_s1 + $0x28] sm:$0xff] }
   0x3   :  { %v27_v7 = vld [vmem:[%s1268_s2 + $0x28] sm:$0xff]  ;;  %v831_v8 = vld [vmem:[%s1267_s1 + $0x38] sm:$0xff] }
   0x4   :  { %v29_v9 = vld [vmem:[%s1268_s2 + $0x38] sm:$0xff] }
   0x6   :  { %265 = vperm.xlu0 %731, %v813_v4   ;;  %55 = vperm.xlu1 %730, %v25_v5  }
   0xa   :  { %273 = vperm.xlu0 %731, %v822_v6   ;;  %65 = vperm.xlu1 %730, %v27_v7  }
   0xb   :  { %11 = vsyncpa [#allocation4], 0  ;;  %v840_v10 = vld [vmem:[%s1267_s1 + $0x48] sm:$0xff]  ;;  %v849_v12 = vld [vmem:[%s1267_s1 + $0x58] sm:$0xff]  ;;  %v767_v19 = vmov 2   ;;  %v768_v26 = vmov 3  }
   0xc   :  { %v31_v11 = vld [vmem:[%s1268_s2 + $0x48] sm:$0xff]  ;;  %v33_v13 = vld [vmem:[%s1268_s2 + $0x58] sm:$0xff]  ;;  %v883_v20 = vld [vmem:[%s1267_s1 + $0x20] sm:$0xff]  ;;  %s769_s18 = smov [#allocation3]  }
   0xd   :  { %v858_v14 = vld [vmem:[%s1267_s1 + $0x68] sm:$0xff]  ;;  %v867_v16 = vld [vmem:[%s1267_s1 + $0x78] sm:$0xff]  ;;  %v890_v21 = vld [vmem:[%s1267_s1 + $0x30] sm:$0xff]  ;;  %s713_s19 = sshll.u32 %s769_s18, 4  ;;  %s714_s19 = int_to_ptr.vmem [resolvable:$true] %s713_s19 }
   0xe   :  { %281 = vperm.xlu0 %731, %v831_v8   ;;  %75 = vperm.xlu1 %730, %v29_v9   ;;  %v35_v15 = vld [vmem:[%s1268_s2 + $0x68] sm:$0xff]  ;;  %v37_v17 = vld [vmem:[%s1268_s2 + $0x78] sm:$0xff]  ;;  %v897_v22 = vld [vmem:[%s1267_s1 + $0x40] sm:$0xff]  ;;  %s741_s20 = scalar_lea.vmem %s714_s19, 16  ;;  %s745_s21 = scalar_lea.vmem %s714_s19, 32 }
   0xf   :  { %v876_v18 = vld [vmem:[%s1267_s1 + $0x8] sm:$0xff]  ;;  %v904_v23 = vld [vmem:[%s1267_s1 + $0x50] sm:$0xff]  ;;  %v911_v24 = vld [vmem:[%s1267_s1 + $0x60] sm:$0xff]  ;;  %p742_p0 = scmp.ne.s32.totalorder %s714_s19, %s741_s20  ;;  %p746_p1 = scmp.lt.s32.totalorder %s714_s19, %s714_s19 }
  0x10   :  { %v918_v25 = vld [vmem:[%s1267_s1 + $0x70] sm:$0xff]  ;;  %v22_v28 = vld [vmem:[%s1268_s2] sm:$0xff]  ;;  %v23_v29 = vld [vmem:[%s1268_s2 + $0x8] sm:$0xff]  ;;  %p747_p2 = scmp.lt.s32.totalorder %s745_s21, %s741_s20 }
  0x11   :  { %v120_v27 = vld [vmem:[%s1267_s1 + $0x10] sm:$0xff]  ;;  %v26_v30 = vld [vmem:[%s1268_s2 + $0x20] sm:$0xff]  ;;  %v573_v46 = vld [vmem:[%s1269_s3 + $0x18] sm:$0xff] }
  0x12   :  { %289 = vperm.xlu0 %731, %v840_v10   ;;  %85 = vperm.xlu1 %730, %v31_v11   ;;  %v28_v31 = vld [vmem:[%s1268_s2 + $0x30] sm:$0xff]  ;;  %v30_v32 = vld [vmem:[%s1268_s2 + $0x40] sm:$0xff]  ;;  %v571_v50 = vld [vmem:[%s1269_s3 + $0x8] sm:$0xff]  ;;  %p748_p3 = por %p747_p2, %p746_p1 }
  0x13   :  { %v32_v33 = vld [vmem:[%s1268_s2 + $0x50] sm:$0xff]  ;;  %v34_v34 = vld [vmem:[%s1268_s2 + $0x60] sm:$0xff]  ;;  %v575_v53 = vld [vmem:[%s1269_s3 + $0x28] sm:$0xff] }
  0x14   :  { %v36_v35 = vld [vmem:[%s1268_s2 + $0x70] sm:$0xff]  ;;  %v570_v40 = vld [vmem:[%s1269_s3] sm:$0xff]  ;;  %v577_v59 = vld [vmem:[%s1269_s3 + $0x38] sm:$0xff]  ;;  %p749_p4 = pnand %p748_p3, %p742_p0 }
  0x15   :  { %v572_v43 = vld [vmem:[%s1269_s3 + $0x10] sm:$0xff]  ;;  %v574_v49 = vld [vmem:[%s1269_s3 + $0x20] sm:$0xff]  ;;  %v579_v5 = vld [vmem:[%s1269_s3 + $0x48] sm:$0xff] }
  0x16   :  { %297 = vperm.xlu0 %731, %v849_v12   ;;  %95 = vperm.xlu1 %730, %v33_v13   ;;  %v576_v56 = vld [vmem:[%s1269_s3 + $0x30] sm:$0xff]  ;;  %v578_v62 = vld [vmem:[%s1269_s3 + $0x40] sm:$0xff] }
  0x17   :  { %v1036_v63 = vld [vmem:[%s1266_s0 + $0x1] ss:$0 sm:$0xff]  ;;  %v580_v13 = vld [vmem:[%s1269_s3 + $0x50] sm:$0xff] }
  0x1a   :  { %305 = vperm.xlu0 %731, %v858_v14   ;;  %105 = vperm.xlu1 %730, %v35_v15  }
  0x1e   :  { %313 = vperm.xlu0 %731, %v867_v16   ;;  %115 = vperm.xlu1 %730, %v37_v17  }
  0x22   :  { %734 = vset.pattern.permute.xlu0 %v767_v19  ;;  %142 = vperm.xlu1 %730, %v876_v18  }
  0x23   :  { %358 = vperm.xlu0 %734, %v876_v18  }
  0x26   :  { %152 = vperm.xlu1 %730, %v813_v4  }
  0x27   :  { %370 = vperm.xlu0 %734, %v883_v20  }
  0x2a   :  { %162 = vperm.xlu1 %730, %v822_v6  }
  0x2b   :  { %378 = vperm.xlu0 %734, %v890_v21  }
  0x2e   :  { %172 = vperm.xlu1 %730, %v831_v8  }
  0x2f   :  { %386 = vperm.xlu0 %734, %v897_v22  }
  0x32   :  { %182 = vperm.xlu1 %730, %v840_v10  }
  0x33   :  { %394 = vperm.xlu0 %734, %v904_v23  }
  0x36   :  { %192 = vperm.xlu1 %730, %v849_v12  }
  0x37   :  { %402 = vperm.xlu0 %734, %v911_v24  }
  0x3a   :  { %202 = vperm.xlu1 %730, %v858_v14  }
  0x3b   :  { %410 = vperm.xlu0 %734, %v918_v25  }
  0x3e   :  { %212 = vperm.xlu1 %730, %v867_v16  }
  0x3f   :  { %735 = vset.pattern.permute.xlu0 %v768_v26 }
  0x40   :  { %455 = vperm.xlu0 %735, %v803_v0  }
  0x42   :  { %732 = vset.pattern.permute.xlu1 %v765_v2 }
  0x43   :  { %257 = vperm.xlu1 %732, %v876_v18  }
  0x44   :  { %467 = vperm.xlu0 %735, %v813_v4  }
  0x47   :  { %261 = vperm.xlu1 %732, %v120_v27  }
  0x48   :  { %737 = vset.pattern.permute.xlu0 %v766_v3 }
  0x49   :  { %40 = vperm.xlu0 %737, %v22_v28  }
  0x4b   :  { %269 = vperm.xlu1 %732, %v883_v20  }
  0x4d   :  { %45 = vperm.xlu0 %737, %v23_v29  }
  0x4f   :  { %277 = vperm.xlu1 %732, %v890_v21  }
  0x51   :  { %60 = vperm.xlu0 %737, %v26_v30  }
  0x53   :  { %285 = vperm.xlu1 %732, %v897_v22  }
  0x55   :  { %70 = vperm.xlu0 %737, %v28_v31   ;;  %v582_v31 = vld [vmem:[%s1269_s3 + $0x60] sm:$0xff] }
  0x57   :  { %293 = vperm.xlu1 %732, %v904_v23  }
  0x59   :  { %80 = vperm.xlu0 %737, %v30_v32  }
  0x5b   :  { %301 = vperm.xlu1 %732, %v911_v24  }
  0x5d   :  { %90 = vperm.xlu0 %737, %v32_v33  }
  0x5f   :  { %309 = vperm.xlu1 %732, %v918_v25  }
  0x61   :  { %100 = vperm.xlu0 %737, %v34_v34  }
  0x63   :  { %733 = vset.pattern.permute.xlu1 %v767_v19 }
  0x64   :  { %354 = vperm.xlu1 %733, %v803_v0  }
  0x65   :  { %110 = vperm.xlu0 %737, %v36_v35  }
  0x68   :  { %362 = vperm.xlu1 %733, %v120_v27  }
  0x69   :  { %137 = vperm.xlu0 %737, %v803_v0   ;;  %v1041_v0 = vld [vmem:[%s1266_s0] ss:$0 sm:$0xff] }
  0x6c   :  { %366 = vperm.xlu1 %733, %v813_v4  }
  0x6d   :  { %147 = vperm.xlu0 %737, %v120_v27  }
  0x70   :  { %374 = vperm.xlu1 %733, %v822_v6  }
  0x71   :  { %157 = vperm.xlu0 %737, %v883_v20  }
  0x74   :  { %382 = vperm.xlu1 %733, %v831_v8  }
  0x75   :  { %167 = vperm.xlu0 %737, %v890_v21  }
  0x78   :  { %390 = vperm.xlu1 %733, %v840_v10  }
  0x79   :  { %177 = vperm.xlu0 %737, %v897_v22  }
  0x7c   :  { %398 = vperm.xlu1 %733, %v849_v12  }
  0x7d   :  { %187 = vperm.xlu0 %737, %v904_v23  }
  0x80   :  { %406 = vperm.xlu1 %733, %v858_v14  }
  0x81   :  { %v973_v36 = vpop.permute.xlu0 %253  ;;  %v975_v37 = vpop.permute.xlu1 %50  ;;  %197 = vperm.xlu0 %737, %v911_v24  }
  0x84   :  { %414 = vperm.xlu1 %733, %v867_v16  }
  0x85   :  { %v266_v38 = vpop.permute.xlu0 %265  ;;  %v56_v39 = vpop.permute.xlu1 %55  ;;  %207 = vperm.xlu0 %737, %v918_v25  }
  0x88   :  { %736 = vset.pattern.permute.xlu1 %v768_v26 }
  0x89   :  { %v274_v41 = vpop.permute.xlu0 %273  ;;  %459 = vperm.xlu1 %736, %v876_v18   ;;  %v66_v42 = vpop.permute.xlu1 %65  ;;  %588 = vperm.xlu0 %737, %v570_v40  }
  0x8a   :  { %v325_v17 = vmul.f32 %v1036_v63, %v274_v41 }
  0x8d   :  { %v282_v44 = vpop.permute.xlu0 %281  ;;  %463 = vperm.xlu1 %736, %v120_v27   ;;  %v76_v45 = vpop.permute.xlu1 %75  ;;  %598 = vperm.xlu0 %737, %v572_v43  }
  0x8e   :  { %v327_v27 = vmul.f32 %v1036_v63, %v282_v44 }
  0x91   :  { %v991_v47 = vpop.permute.xlu0 %289  ;;  %471 = vperm.xlu1 %736, %v883_v20   ;;  %v86_v48 = vpop.permute.xlu1 %85  ;;  %603 = vperm.xlu0 %737, %v573_v46  }
  0x95   :  { %v1000_v51 = vpop.permute.xlu0 %297  ;;  %738 = vset.pattern.permute.xlu1 %v766_v3  ;;  %v1003_v52 = vpop.permute.xlu1 %95  ;;  %608 = vperm.xlu0 %737, %v574_v49  }
  0x96   :  { %593 = vperm.xlu1 %738, %v571_v50  }
  0x99   :  { %v1008_v54 = vpop.permute.xlu0 %305  ;;  %v1010_v55 = vpop.permute.xlu1 %105  ;;  %613 = vperm.xlu0 %737, %v575_v53  }
  0x9a   :  { %739 = vset.pattern.permute.xlu1 %v768_v26  ;;  %v333_v46 = vmul.f32 %v1036_v63, %v1008_v54 }
  0x9b   :  { %475 = vperm.xlu1 %739, %v822_v6   ;;  %v323_v6 = vmul.f32 %v1036_v63, %v266_v38 }
  0x9d   :  { %v1017_v57 = vpop.permute.xlu0 %313  ;;  %v1019_v58 = vpop.permute.xlu1 %115  ;;  %618 = vperm.xlu0 %737, %v576_v56  }
  0x9f   :  { %479 = vperm.xlu1 %739, %v890_v21  }
  0xa1   :  { %v1025_v60 = vpop.permute.xlu1 %142  ;;  %623 = vperm.xlu0 %737, %v577_v59  }
  0xa2   :  { %v1027_v61 = vpop.permute.xlu0 %358  ;;  %v220_v59 = vmul.f32 %v1041_v0, %v1025_v60 }
  0xa3   :  { %483 = vperm.xlu1 %739, %v831_v8  }
  0xa5   :  { %v153_v1 = vpop.permute.xlu1 %152  ;;  %628 = vperm.xlu0 %737, %v578_v62  }
  0xa6   :  { %v222_v2 = vmul.f32 %v1041_v0, %v153_v1  ;;  %v1044_v4 = vpop.permute.xlu0 %370 }
  0xa7   :  { %487 = vperm.xlu1 %739, %v897_v22   ;;  %v581_v22 = vld [vmem:[%s1269_s3 + $0x58] sm:$0xff] }
  0xa8   :  { %v238_v7 = vadd.f32 %v222_v2, %v56_v39  ;;  %v584_v39 = vld [vmem:[%s1269_s3 + $0x70] sm:$0xff] }
  0xa9   :  { %v163_v8 = vpop.permute.xlu1 %162  ;;  %633 = vperm.xlu0 %737, %v579_v5  }
  0xaa   :  { %v224_v9 = vmul.f32 %v1041_v0, %v163_v8  ;;  %v1052_v11 = vpop.permute.xlu0 %378  ;;  %v1057_v15 = vadd.f32 %v323_v6, %v238_v7 }
  0xab   :  { %491 = vperm.xlu1 %739, %v840_v10  }
  0xac   :  { %v240_v18 = vadd.f32 %v224_v9, %v66_v42 }
  0xad   :  { %v173_v19 = vpop.permute.xlu1 %172  ;;  %638 = vperm.xlu0 %737, %v580_v13  }
  0xae   :  { %v226_v20 = vmul.f32 %v1041_v0, %v173_v19  ;;  %v1062_v21 = vpop.permute.xlu0 %386  ;;  %v1067_v26 = vadd.f32 %v325_v17, %v240_v18 }
  0xaf   :  { %495 = vperm.xlu1 %739, %v904_v23   ;;  %v329_v23 = vmul.f32 %v1036_v63, %v991_v47 }
  0xb0   :  { %v242_v10 = vadd.f32 %v226_v20, %v76_v45 }
  0xb1   :  { %v183_v28 = vpop.permute.xlu1 %182  ;;  %643 = vperm.xlu0 %737, %v581_v22  }
  0xb2   :  { %v228_v29 = vmul.f32 %v1041_v0, %v183_v28  ;;  %v1072_v30 = vpop.permute.xlu0 %394  ;;  %v1077_v32 = vadd.f32 %v327_v27, %v242_v10 }
  0xb3   :  { %499 = vperm.xlu1 %739, %v849_v12   ;;  %v331_v12 = vmul.f32 %v1036_v63, %v1000_v51  ;;  %v335_v51 = vmul.f32 %v1036_v63, %v1017_v57  ;;  %v585_v57 = vld [vmem:[%s1269_s3 + $0x78] sm:$0xff] }
  0xb4   :  { %v244_v33 = vadd.f32 %v228_v29, %v86_v48 }
  0xb5   :  { %v193_v34 = vpop.permute.xlu1 %192  ;;  %648 = vperm.xlu0 %737, %v582_v31   ;;  %v320_v31 = vmul.f32 %v1036_v63, %v973_v36 }
  0xb6   :  { %v230_v35 = vmul.f32 %v1041_v0, %v193_v34  ;;  %v1083_v38 = vpop.permute.xlu0 %402  ;;  %v1088_v40 = vadd.f32 %v329_v23, %v244_v33  ;;  %v1146_v23 = vld [vmem:[%s1266_s0 + $0x3] ss:$0 sm:$0xff] }
  0xb7   :  { %503 = vperm.xlu1 %739, %v911_v24  }
  0xb8   :  { %v246_v41 = vadd.f32 %v230_v35, %v1003_v52 }
  0xb9   :  { %v203_v42 = vpop.permute.xlu1 %202  ;;  %658 = vperm.xlu0 %737, %v584_v39  }
  0xba   :  { %v232_v43 = vmul.f32 %v1041_v0, %v203_v42  ;;  %v1095_v44 = vadd.f32 %v331_v12, %v246_v41  ;;  %v1097_v45 = vpop.permute.xlu0 %410 }
  0xbb   :  { %507 = vperm.xlu1 %739, %v858_v14  }
  0xbc   :  { %v248_v24 = vadd.f32 %v232_v43, %v1010_v55  ;;  %v583_v55 = vld [vmem:[%s1269_s3 + $0x68] sm:$0xff] }
  0xbd   :  { %v213_v47 = vpop.permute.xlu1 %212 }
  0xbe   :  { %v234_v48 = vmul.f32 %v1041_v0, %v213_v47  ;;  %v1104_v49 = vadd.f32 %v333_v46, %v248_v24 }
  0xbf   :  { %511 = vperm.xlu1 %739, %v918_v25   ;;  %v456_v50 = vpop.permute.xlu0 %455 }
  0xc0   :  { %v250_v52 = vadd.f32 %v234_v48, %v1019_v58  ;;  %v522_v46 = vmul.f32 %v1146_v23, %v456_v50 }
  0xc2   :  { %v258_v53 = vpop.permute.xlu1 %257  ;;  %v1110_v14 = vadd.f32 %v335_v51, %v250_v52 }
  0xc3   :  { %515 = vperm.xlu1 %739, %v867_v16   ;;  %v468_v54 = vpop.permute.xlu0 %467  ;;  %v1127_v16 = vld [vmem:[%s1266_s0 + $0x2] ss:$0 sm:$0xff]  ;;  %v321_v1 = vmul.f32 %v1036_v63, %v258_v53 }
  0xc4   :  { %v422_v5 = vmul.f32 %v1127_v16, %v1027_v61  ;;  %v525_v42 = vmul.f32 %v1146_v23, %v468_v54 }
  0xc6   :  { %v1116_v56 = vpop.permute.xlu1 %261 }
  0xc7   :  { %740 = vset.pattern.permute.xlu1 %v766_v3 }
  0xc8   :  { %653 = vperm.xlu1 %740, %v583_v55   ;;  %v41_v25 = vpop.permute.xlu0 %40 }
  0xca   :  { %v270_v58 = vpop.permute.xlu1 %269 }
  0xcb   :  { %v324_v53 = vmul.f32 %v1036_v63, %v270_v58  ;;  %v427_v58 = vmul.f32 %v1127_v16, %v1052_v11 }
  0xcc   :  { %663 = vperm.xlu1 %740, %v585_v57   ;;  %v46_v62 = vpop.permute.xlu0 %45 }
  0xcd   :  { %v236_v3 = vadd.f32 %v220_v59, %v46_v62 }
  0xce   :  { %v278_v2 = vpop.permute.xlu1 %277 }
  0xcf   :  { %v337_v6 = vadd.f32 %v321_v1, %v236_v3  ;;  %v326_v59 = vmul.f32 %v1036_v63, %v278_v2  ;;  %v429_v2 = vmul.f32 %v1127_v16, %v1062_v21 }
  0xd0   :  { %v61_v7 = vpop.permute.xlu0 %60 }
  0xd1   :  { %v1132_v8 = vadd.f32 %v422_v5, %v337_v6 }
  0xd2   :  { %v286_v9 = vpop.permute.xlu1 %285 }
  0xd4   :  { %v71_v60 = vpop.permute.xlu0 %70 }
  0xd6   :  { %v294_v13 = vpop.permute.xlu1 %293 }
  0xd8   :  { %v81_v17 = vpop.permute.xlu0 %80 }
  0xda   :  { %v302_v18 = vpop.permute.xlu1 %301 }
  0xdb   :  { %v332_v21 = vmul.f32 %v1036_v63, %v302_v18 }
  0xdc   :  { %v91_v19 = vpop.permute.xlu0 %90 }
  0xde   :  { %v1134_v20 = vpop.permute.xlu1 %309 }
  0xe0   :  { %v101_v22 = vpop.permute.xlu0 %100 }
  0xe3   :  { %v355_v27 = vpop.permute.xlu1 %354 }
  0xe4   :  { %v1136_v10 = vpop.permute.xlu0 %110  ;;  %v421_v12 = vmul.f32 %v1127_v16, %v355_v27  ;;  %v328_v27 = vmul.f32 %v1036_v63, %v286_v9 }
  0xe7   :  { %v1138_v28 = vpop.permute.xlu1 %362 }
  0xe8   :  { %v138_v29 = vpop.permute.xlu0 %137 }
  0xe9   :  { %v219_v61 = vmul.f32 %v1041_v0, %v138_v29 }
  0xeb   :  { %v235_v33 = vadd.f32 %v219_v61, %v41_v25  ;;  %v367_v34 = vpop.permute.xlu1 %366 }
  0xec   :  { %v424_v35 = vmul.f32 %v1127_v16, %v367_v34  ;;  %v148_v39 = vpop.permute.xlu0 %147  ;;  %v330_v34 = vmul.f32 %v1036_v63, %v294_v13 }
  0xed   :  { %v336_v41 = vadd.f32 %v320_v31, %v235_v33 }
  0xee   :  { %v440_v43 = vadd.f32 %v424_v35, %v1057_v15  ;;  %v425_v15 = vmul.f32 %v1127_v16, %v1044_v4 }
  0xef   :  { %v1153_v36 = vpop.permute.xlu1 %374  ;;  %v437_v24 = vadd.f32 %v421_v12, %v336_v41 }
  0xf0   :  { %v158_v47 = vpop.permute.xlu0 %157  ;;  %v1155_v48 = vadd.f32 %v525_v42, %v440_v43  ;;  %v221_v43 = vmul.f32 %v1041_v0, %v148_v39 }
  0xf1   :  { %v223_v51 = vmul.f32 %v1041_v0, %v158_v47  ;;  %v1158_v52 = vadd.f32 %v522_v46, %v437_v24  ;;  %v433_v47 = vmul.f32 %v1127_v16, %v1083_v38  ;;  %v435_v38 = vmul.f32 %v1127_v16, %v1097_v45 }
  0xf3   :  { %v239_v55 = vadd.f32 %v223_v51, %v61_v7  ;;  %v1161_v25 = vpop.permute.xlu1 %382 }
  0xf4   :  { %v168_v54 = vpop.permute.xlu0 %167 }
  0xf5   :  { %v340_v50 = vadd.f32 %v324_v53, %v239_v55  ;;  %v225_v57 = vmul.f32 %v1041_v0, %v168_v54  ;;  %v334_v55 = vmul.f32 %v1036_v63, %v1134_v20 }
  0xf7   :  { %v241_v62 = vadd.f32 %v225_v57, %v71_v60  ;;  %v1167_v1 = vpop.permute.xlu1 %390  ;;  %v441_v3 = vadd.f32 %v425_v15, %v340_v50 }
  0xf8   :  { %v178_v5 = vpop.permute.xlu0 %177 }
  0xf9   :  { %v342_v6 = vadd.f32 %v326_v59, %v241_v62  ;;  %v227_v7 = vmul.f32 %v1041_v0, %v178_v5 }
  0xfb   :  { %v243_v29 = vadd.f32 %v227_v7, %v81_v17  ;;  %v1173_v4 = vpop.permute.xlu1 %398  ;;  %v1175_v61 = vadd.f32 %v427_v58, %v342_v6  ;;  %v431_v17 = vmul.f32 %v1127_v16, %v1072_v30  ;;  %v237_v30 = vadd.f32 %v221_v43, %v975_v37 }
  0xfc   :  { %v188_v31 = vpop.permute.xlu0 %187  ;;  %v423_v37 = vmul.f32 %v1127_v16, %v1138_v28  ;;  %v554_v7 = vmax.f32 %v1158_v52, 0.0 }
  0xfd   :  { %v344_v60 = vadd.f32 %v328_v27, %v243_v29  ;;  %v229_v33 = vmul.f32 %v1041_v0, %v188_v31 }
  0xff   :  { %v245_v11 = vadd.f32 %v229_v33, %v91_v19  ;;  %v1181_v35 = vpop.permute.xlu1 %406  ;;  %v1183_v12 = vadd.f32 %v429_v2, %v344_v60 }
 0x100   :  { %v198_v9 = vpop.permute.xlu0 %197 }
 0x101   :  { %v346_v41 = vadd.f32 %v330_v34, %v245_v11  ;;  %v231_v42 = vmul.f32 %v1041_v0, %v198_v9  ;;  %v426_v34 = vmul.f32 %v1127_v16, %v1153_v36  ;;  %v428_v36 = vmul.f32 %v1127_v16, %v1161_v25 }
 0x102   :  { %v430_v25 = vmul.f32 %v1127_v16, %v1167_v1  ;;  %v432_v1 = vmul.f32 %v1127_v16, %v1173_v4 }
 0x103   :  { %v247_v46 = vadd.f32 %v231_v42, %v101_v22  ;;  %v1190_v24 = vpop.permute.xlu1 %414  ;;  %v1192_v13 = vadd.f32 %v431_v17, %v346_v41  ;;  %v322_v22 = vmul.f32 %v1036_v63, %v1116_v56  ;;  %v442_v52 = vadd.f32 %v426_v34, %v1067_v26 }
 0x104   :  { %v208_v19 = vpop.permute.xlu0 %207  ;;  %v444_v26 = vadd.f32 %v428_v36, %v1077_v32 }
 0x105   :  { %v348_v51 = vadd.f32 %v332_v21, %v247_v46  ;;  %v233_v53 = vmul.f32 %v1041_v0, %v208_v19  ;;  %v338_v57 = vadd.f32 %v322_v22, %v237_v30 }
 0x107   :  { %v249_v39 = vadd.f32 %v233_v53, %v1136_v10  ;;  %v1201_v18 = vadd.f32 %v433_v47, %v348_v51  ;;  %v439_v5 = vadd.f32 %v423_v37, %v338_v57 }
 0x108   :  { %v460_v54 = vpop.permute.xlu1 %459  ;;  %v589_v15 = vpop.permute.xlu0 %588 }
 0x109   :  { %v350_v50 = vadd.f32 %v334_v55, %v249_v39  ;;  %v523_v20 = vmul.f32 %v1146_v23, %v460_v54  ;;  %v666_v60 = vmul.f32 %v589_v15, %v554_v7 }
 0x10b   :  { %v1207_v0 = vadd.f32 %v435_v38, %v350_v50  ;;  %v539_v63 = vadd.f32 %v523_v20, %v1132_v8  ;;  %v557_v8 = vmax.f32 %v1155_v48, 0.0 }
 0x10c   :  { %v464_v10 = vpop.permute.xlu1 %463  ;;  %v599_v59 = vpop.permute.xlu0 %598 }
 0x10d   :  { %v524_v62 = vmul.f32 %v1146_v23, %v464_v10  ;;  %v555_v28 = vmax.f32 %v539_v63, 0.0 }
 0x10f   :  { %v540_v56 = vadd.f32 %v524_v62, %v439_v5 }
 0x110   :  { %v472_v58 = vpop.permute.xlu1 %471  ;;  %v604_v6 = vpop.permute.xlu0 %603 }
 0x111   :  { %v526_v45 = vmul.f32 %v1146_v23, %v472_v58  ;;  %v556_v27 = vmax.f32 %v540_v56, 0.0  ;;  %v669_v42 = vmul.f32 %v604_v6, %v557_v8  ;;  %v446_v6 = vadd.f32 %v430_v25, %v1088_v40 }
 0x112   :  { %v448_v40 = vadd.f32 %v432_v1, %v1095_v44  ;;  %v434_v44 = vmul.f32 %v1127_v16, %v1181_v35 }
 0x113   :  { %v542_v29 = vadd.f32 %v526_v45, %v441_v3  ;;  %v668_v11 = vmul.f32 %v599_v59, %v556_v27 }
 0x114   :  { %v609_v31 = vpop.permute.xlu0 %608 }
 0x115   :  { %v594_v2 = vpop.permute.xlu1 %593  ;;  %v558_v9 = vmax.f32 %v542_v29, 0.0 }
 0x116   :  { %v667_v33 = vmul.f32 %v594_v2, %v555_v28 }
 0x117   :  { %v670_v46 = vmul.f32 %v609_v31, %v558_v9 }
 0x118   :  { %v682_v17 = vadd.f32 %v667_v33, %v666_v60  ;;  %v614_v41 = vpop.permute.xlu0 %613 }
 0x11a   :  { %v683_v43 = vadd.f32 %v682_v17, %v668_v11  ;;  %v476_v21 = vpop.permute.xlu1 %475 }
 0x11b   :  { %v527_v3 = vmul.f32 %v1146_v23, %v476_v21 }
 0x11c   :  { %v684_v19 = vadd.f32 %v683_v43, %v669_v42  ;;  %v619_v47 = vpop.permute.xlu0 %618 }
 0x11d   :  { %v543_v51 = vadd.f32 %v527_v3, %v442_v52 }
 0x11e   :  { %v685_v53 = vadd.f32 %v684_v19, %v670_v46  ;;  %v480_v30 = vpop.permute.xlu1 %479 }
 0x11f   :  { %v559_v48 = vmax.f32 %v543_v51, 0.0  ;;  %v528_v55 = vmul.f32 %v1146_v23, %v480_v30 }
 0x120   :  { %v624_v39 = vpop.permute.xlu0 %623 }
 0x121   :  { %v671_v22 = vmul.f32 %v614_v41, %v559_v48  ;;  %v544_v54 = vadd.f32 %v528_v55, %v1175_v61 }
 0x122   :  { %v484_v15 = vpop.permute.xlu1 %483 }
 0x123   :  { %v686_v38 = vadd.f32 %v685_v53, %v671_v22  ;;  %v560_v50 = vmax.f32 %v544_v54, 0.0  ;;  %v529_v57 = vmul.f32 %v1146_v23, %v484_v15  ;;  %v450_v54 = vadd.f32 %v434_v44, %v1104_v49 }
 0x124   :  { %v629_v37 = vpop.permute.xlu0 %628  ;;  %v436_v15 = vmul.f32 %v1127_v16, %v1190_v24 }
 0x125   :  { %v672_v20 = vmul.f32 %v619_v47, %v560_v50  ;;  %v545_v10 = vadd.f32 %v529_v57, %v444_v26 }
 0x126   :  { %v488_v59 = vpop.permute.xlu1 %487  ;;  %v452_v35 = vadd.f32 %v436_v15, %v1110_v14  ;;  %v704_v14 = vstv %s1270_s4 }
 0x127   :  { %v687_v62 = vadd.f32 %v686_v38, %v672_v20  ;;  %v561_v5 = vmax.f32 %v545_v10, 0.0  ;;  %v530_v63 = vmul.f32 %v1146_v23, %v488_v59 }
 0x128   :  { %v634_v58 = vpop.permute.xlu0 %633 }
 0x129   :  { %v673_v56 = vmul.f32 %v624_v39, %v561_v5  ;;  %v546_v61 = vadd.f32 %v530_v63, %v1183_v12 }
 0x12a   :  { %v492_v32 = vpop.permute.xlu1 %491 }
 0x12b   :  { %v688_v45 = vadd.f32 %v687_v62, %v673_v56  ;;  %v562_v7 = vmax.f32 %v546_v61, 0.0  ;;  %v531_v27 = vmul.f32 %v1146_v23, %v492_v32 }
 0x12c   :  { %v639_v34 = vpop.permute.xlu0 %638 }
 0x12d   :  { %v674_v29 = vmul.f32 %v629_v37, %v562_v7  ;;  %v547_v31 = vadd.f32 %v531_v27, %v446_v6 }
 0x12e   :  { %v496_v28 = vpop.permute.xlu1 %495 }
 0x12f   :  { %v689_v2 = vadd.f32 %v688_v45, %v674_v29  ;;  %v563_v60 = vmax.f32 %v547_v31, 0.0  ;;  %v532_v33 = vmul.f32 %v1146_v23, %v496_v28 }
 0x130   :  { %v644_v21 = vpop.permute.xlu0 %643 }
 0x131   :  { %v675_v12 = vmul.f32 %v634_v58, %v563_v60  ;;  %v548_v11 = vadd.f32 %v532_v33, %v1192_v13 }
 0x132   :  { %v500_v8 = vpop.permute.xlu1 %499 }
 0x133   :  { %v690_v9 = vadd.f32 %v689_v2, %v675_v12  ;;  %v564_v17 = vmax.f32 %v548_v11, 0.0  ;;  %v533_v41 = vmul.f32 %v1146_v23, %v500_v8 }
 0x134   :  { %v649_v30 = vpop.permute.xlu0 %648 }
 0x135   :  { %v676_v42 = vmul.f32 %v639_v34, %v564_v17  ;;  %v549_v43 = vadd.f32 %v533_v41, %v448_v40 }
 0x136   :  { %v504_v52 = vpop.permute.xlu1 %503 }
 0x137   :  { %v691_v4 = vadd.f32 %v690_v9, %v676_v42  ;;  %v565_v3 = vmax.f32 %v549_v43, 0.0  ;;  %v534_v46 = vmul.f32 %v1146_v23, %v504_v52 }
 0x138   :  { %v659_v25 = vpop.permute.xlu0 %658 }
 0x139   :  { %v677_v19 = vmul.f32 %v644_v21, %v565_v3  ;;  %v550_v47 = vadd.f32 %v534_v46, %v1201_v18 }
 0x13a   :  { %v508_v51 = vpop.permute.xlu1 %507 }
 0x13b   :  { %v566_v13 = vmax.f32 %v550_v47, 0.0  ;;  %v692_v53 = vadd.f32 %v691_v4, %v677_v19  ;;  %v535_v48 = vmul.f32 %v1146_v23, %v508_v51 }
 0x13d   :  { %v678_v36 = vmul.f32 %v649_v30, %v566_v13  ;;  %v551_v18 = vadd.f32 %v535_v48, %v450_v54 }
 0x13e   :  { %v512_v55 = vpop.permute.xlu1 %511 }
 0x13f   :  { %v536_v39 = vmul.f32 %v1146_v23, %v512_v55  ;;  %v693_v22 = vadd.f32 %v692_v53, %v678_v36  ;;  %v567_v20 = vmax.f32 %v551_v18, 0.0 }
 0x141   :  { %v552_v26 = vadd.f32 %v536_v39, %v1207_v0 }
 0x142   :  { %v516_v38 = vpop.permute.xlu1 %515 }
 0x143   :  { %v537_v50 = vmul.f32 %v1146_v23, %v516_v38  ;;  %v568_v57 = vmax.f32 %v552_v26, 0.0 }
 0x145   :  { %v553_v37 = vadd.f32 %v537_v50, %v452_v35  ;;  %v680_v62 = vmul.f32 %v659_v25, %v568_v57 }
 0x147   :  { %v654_v10 = vpop.permute.xlu1 %653  ;;  %v569_v49 = vmax.f32 %v553_v37, 0.0 }
 0x148   :  { %v679_v59 = vmul.f32 %v654_v10, %v567_v20 }
 0x14a   :  { %v694_v5 = vadd.f32 %v693_v22, %v679_v59 }
 0x14b   :  { %v664_v63 = vpop.permute.xlu1 %663 }
 0x14c   :  { %v681_v56 = vmul.f32 %v664_v63, %v569_v49  ;;  %v695_v16 = vadd.f32 %v694_v5, %v680_v62 }
 0x14e   :  { %v696_v24 = vadd.f32 %v695_v16, %v681_v56 }
 0x150   :  { %v697_v61 = vrot.slane %v696_v24, 4 }
 0x152   :  { %v698_v0 = vadd.f32 %v697_v61, %v696_v24 }
 0x154   :  { %v699_v58 = vrot.slane %v698_v0, 2 }
 0x156   :  { %v700_v32 = vadd.f32 %v699_v58, %v698_v0 }
 0x158   :  { %v701_v23 = vrot.slane %v700_v32, 1 }
 0x15a   :  { %v702_v6 = vadd.f32 %v701_v23, %v700_v32 }
 0x15c   :  { %v705_v45 = vadd.f32 %v704_v14, %v702_v6 }
 0x15e   :  { %706 = vst [vmem:[#allocation3] sm:$0x1] %v705_v45 }
 0x15f   :  { %752 = shalt.err (!%p749_p4)
}
 0x160   :  { %s753_s23 = scalar_lea.hbm %s1271_s5, 16 }
 0x161   :  { %p754_p5 = scmp.ne.s32.totalorder %s1271_s5, %s753_s23  ;;  %p757_p6 = scmp.lt.u32.totalorder %s753_s23, %s1271_s5 }
 0x163   :  { %p759_p7 = pnand %p757_p6, %p754_p5 }
 0x165   :  { %762 = shalt.err (!%p759_p7)
}
 0x166   :  { %716 = dma.vmem_to_hbm [thread:$0]  %s714_s19, 16, %s1271_s5, [#allocation4]  }
 0x167   :  { %763 = dma.done.wait [#allocation4], 16  }
 0x168   :  { %764 = vsyncadd [#allocation4], 4294967280 }
 0x169   :  { %720 = vsyncpa [#allocation4], 1 }

</bundles_post_ra>
